<compile_context>
chip_gen: v7x
topology: tpu7x:2x2x1
jax: 0.10.0
libtpu: 0.0.40
codegen_flags: <defaults>
</compile_context>

<pallas_src>
import numpy as np

import jax
import jax.numpy as jnp
from jax.experimental import pallas as pl
from jax.experimental.pallas import tpu as pltpu


def _resiblock_kernel(x_ref, w1_ref, w2_ref, g1_ref, b1_ref, g2_ref, b2_ref,
                      fc1w_ref, fc1b_ref, fc2w_ref, fc2b_ref,
                      fold_ref, bcast_ref, sdn_ref, sup_ref, out_ref):
    B, H, L = x_ref.shape            # L = W * C (lane-dense, = 128 here)
    C = g1_ref.shape[-1]
    W = L // C
    BH = B * H
    eps = 1e-5
    inv_n = 1.0 / (B * H * W)        # BN normalizer over (N, H, W)
    inv_hw = 1.0 / (H * W)           # SE avg-pool normalizer

    x = x_ref[...].astype(jnp.float32)        # (B, H, L)
    xf = x.reshape(BH, L)
    fold = fold_ref[...]                      # (L, C)  one-hot: fold W out of lanes
    bcast = bcast_ref[...]                    # (C, L)  one-hot: broadcast channel -> lanes
    sdn = sdn_ref[...]                        # (BH, BH) row-shift-down operator (edge rows zero)
    sup = sup_ref[...]                        # (BH, BH) row-shift-up operator   (edge rows zero)

    def conv3x3(tf, w_ref):
        # One matmul for all three H-taps: the weight is lane-concatenated
        # per tap, (L, 3L), W-banded so W-shift + W zero-padding live inside
        # the band.  The three partials are 128-aligned lane slices; the
        # H-shift of each tap (shift-after-matmul) is applied with two tiny
        # shift matmuls whose operators also mask the top/bottom image rows
        # and batch boundaries.  No padded intermediates, no misaligned
        # sublane slices, no 3x patch materialization.
        z = jnp.dot(tf, w_ref[...], preferred_element_type=jnp.float32)      # (BH, 3L)
        y = jnp.dot(sdn, z[:, :L], preferred_element_type=jnp.float32)       # tap dy=0
        y = y + z[:, L:2 * L]                                                # tap dy=1
        y = y + jnp.dot(sup, z[:, 2 * L:], preferred_element_type=jnp.float32)  # tap dy=2
        return y                                                             # (BH, L)

    def batchnorm(td, gamma, beta):
        # Fused one-pass stats: sum(x) and sum(x^2) via ONE row-stacked
        # matmul against the one-hot fold (32-row blocks are 8-sublane
        # aligned, so the concat is cheap); scale/shift broadcast back to
        # lanes with ONE stacked matmul.  rsqrt rides the EUP slot.
        st = jnp.concatenate([td, td * td], axis=0)                          # (2BH, L)
        cs = jnp.dot(st, fold, preferred_element_type=jnp.float32)           # (2BH, C)
        cs1 = cs[:BH]                                                        # per-row sum_W
        cs2 = cs[BH:]                                                        # per-row sum_W x^2
        mean = jnp.sum(cs1, axis=0, keepdims=True) * inv_n                   # (1, C)
        ex2 = jnp.sum(cs2, axis=0, keepdims=True) * inv_n                    # (1, C)
        var = ex2 - mean * mean                                              # biased var
        scale = gamma * jax.lax.rsqrt(var + eps)                             # (1, C)
        shift = beta - mean * scale                                          # (1, C)
        ss = jnp.concatenate([scale, shift], axis=0)                         # (2, C)
        ssd = jnp.dot(ss, bcast, preferred_element_type=jnp.float32)         # (2, L)
        return td * ssd[0:1, :] + ssd[1:2, :], cs1, scale, shift

    # conv1 -> bn1 -> relu
    t = conv3x3(xf, w1_ref)
    t, _, _, _ = batchnorm(t, g1_ref[...], b1_ref[...])
    t = jnp.maximum(t, 0.0)

    # conv2 -> bn2
    t2 = conv3x3(t, w2_ref)
    t2n, cs1_2, scale2, shift2 = batchnorm(t2, g2_ref[...], b2_ref[...])     # (BH, L)

    # Squeeze-Excite: reuse bn2's per-row channel sums for the global average
    # pool (affine BN commutes with the mean), then tiny FC->ReLU->FC->sigmoid
    # (sigmoid rides the EUP slot).
    pool = jnp.sum(cs1_2.reshape(B, H, C), axis=1) * inv_hw                  # (B, C) mean pre-BN
    pool = pool * scale2 + shift2                                            # (B, C) mean post-BN
    y = jnp.maximum(
        jnp.dot(pool, fc1w_ref[...], preferred_element_type=jnp.float32)
        + fc1b_ref[...], 0.0)                                                # (B, C/2)
    y = jax.nn.sigmoid(
        jnp.dot(y, fc2w_ref[...], preferred_element_type=jnp.float32)
        + fc2b_ref[...])                                                     # (B, C)
    y_d = jnp.dot(y, bcast, preferred_element_type=jnp.float32)              # (B, L)

    # residual add + final ReLU (all lane-dense, unmasked vst)
    out = jnp.maximum(x + t2n.reshape(B, H, L) * y_d[:, None, :], 0.0)
    out_ref[...] = out.astype(out_ref.dtype)


def prepare_resiblock(params, x_shape):
    """Precompute everything that does not depend on activation values.

    Called ONCE outside the per-step jit (perf review: do not re-expand the
    3x3 weights or rebuild the constant helper matrices every forward).
    Conv weights are HWIO (3, 3, Cin, Cout); BN gamma/beta are (C,); SE FC
    weights are (in, out) with 1-D biases.
    """
    w1, w2, g1, b1, g2, b2, fc1w, fc1b, fc2w, fc2b = params
    B, C, H, W = x_shape
    L = W * C
    BH = B * H

    # --- W-banded, lane-concatenated per-tap conv weights: (L, 3L) -------
    # wcat[w'*C+ci, dy*L + w*C+co] = w_hwio[dy, w'-w+1, ci, co] (0 outside band)
    wp = np.arange(W)[:, None]          # w' (input column)
    wq = np.arange(W)[None, :]          # w  (output column)
    dxm = wp - wq + 1                   # stencil tap index dx for (w', w)
    valid = jnp.asarray((dxm >= 0) & (dxm <= 2))
    dxc = jnp.asarray(np.clip(dxm, 0, 2))

    def expand_cat(w_hwio):
        band = w_hwio[:, dxc, :, :]                               # (3, W, W, C, C) [dy,w',w,ci,co]
        band = jnp.where(valid[None, :, :, None, None], band, 0.0)
        band = jnp.transpose(band, (1, 3, 0, 2, 4))               # (w', ci, dy, w, co)
        return band.reshape(L, 3 * L)

    wcat1 = expand_cat(w1)
    wcat2 = expand_cat(w2)

    # --- constant one-hot helpers (pure constants, built with numpy) -----
    fold = np.tile(np.eye(C, dtype=np.float32), (W, 1))           # (L, C)
    bcast = np.ascontiguousarray(fold.T)                          # (C, L)

    # Row-shift operators (flat over B*H): shift-down feeds tap dy=0, shift-up
    # feeds tap dy=2; both zero the image-edge rows and never cross batches.
    rr = np.arange(BH)
    hh = rr % H
    sdn = ((rr[:, None] - 1 == rr[None, :]) & (hh[:, None] >= 1)).astype(np.float32)
    sup = ((rr[:, None] + 1 == rr[None, :]) & (hh[:, None] <= H - 2)).astype(np.float32)

    return (wcat1, wcat2,
            g1.reshape(1, C), b1.reshape(1, C), g2.reshape(1, C), b2.reshape(1, C),
            fc1w, fc1b.reshape(1, -1), fc2w, fc2b.reshape(1, -1),
            jnp.asarray(fold), jnp.asarray(bcast), jnp.asarray(sdn), jnp.asarray(sup))


def resiblock_lane_dense(xd, prep):
    """Production entry: xd is (B, H, W*C) lane-dense float32."""
    (wcat1, wcat2, g1, b1, g2, b2, fc1w, fc1b, fc2w, fc2b,
     fold, bcast, sdn, sup) = prep
    B, H, L = xd.shape
    C = g1.shape[-1]
    BH = B * H

    flops = (2 * 2 * BH * L * (3 * L)          # two conv tap matmuls
             + 4 * 2 * BH * BH * L             # four row-shift matmuls
             + 2 * 2 * (2 * BH) * L * C        # two fused BN stats matmuls
             + 2 * 2 * 2 * C * L               # two BN scale/shift broadcasts
             + 2 * 2 * B * C * (C // 2)        # SE FC layers
             + 2 * B * C * L                   # SE gate broadcast
             + 12 * BH * L)                    # elementwise
    bytes_accessed = 4 * (2 * BH * L           # x in + out
                          + 2 * L * 3 * L      # expanded weights
                          + 2 * BH * BH        # shift operators
                          + 2 * L * C          # fold + bcast
                          + 8 * C)             # BN/SE params
    cost = pl.CostEstimate(flops=int(flops),
                           transcendentals=int(2 * C + B * C),
                           bytes_accessed=int(bytes_accessed))

    vmem = pl.BlockSpec(memory_space=pltpu.MemorySpace.VMEM)
    return pl.pallas_call(
        _resiblock_kernel,
        out_shape=jax.ShapeDtypeStruct((B, H, L), xd.dtype),
        in_specs=[vmem] * 15,
        out_specs=vmem,
        compiler_params=pltpu.CompilerParams(vmem_limit_bytes=32 * 1024 * 1024),
        cost_estimate=cost,
    )(xd, wcat1, wcat2, g1, b1, g2, b2, fc1w, fc1b, fc2w, fc2b,
      fold, bcast, sdn, sup)


def resiblock_forward_nchw(x_nchw, prep):
    """Drop-in adapter matching the PyTorch NCHW interface.

    # TODO(synk): for production, keep the surrounding model in the lane-dense
    # NHWC layout end-to-end (or fold the layout change into halo-aware
    # BlockSpecs) so these two whole-activation HBM round-trip transposes
    # disappear; call resiblock_lane_dense() directly.
    """
    B, C, H, W = x_nchw.shape
    xd = jnp.transpose(x_nchw, (0, 2, 3, 1)).reshape(B, H, W * C)
    out = resiblock_lane_dense(xd, prep)
    return jnp.transpose(out.reshape(B, H, W, C), (0, 3, 1, 2))


def reference(x_nchw, params):
    """Pure-JAX reference (same math via XLA conv) for validation."""
    w1, w2, g1, b1, g2, b2, fc1w, fc1b, fc2w, fc2b = params
    x = jnp.transpose(x_nchw, (0, 2, 3, 1))
    dn = ('NHWC', 'HWIO', 'NHWC')
    hp = jax.lax.Precision.HIGHEST

    def conv(t, w):
        return jax.lax.conv_general_dilated(t, w, (1, 1), 'SAME',
                                            dimension_numbers=dn, precision=hp)

    def bn(t, g, b):
        m = jnp.mean(t, axis=(0, 1, 2), keepdims=True)
        v = jnp.mean((t - m) ** 2, axis=(0, 1, 2), keepdims=True)
        return ((t - m) / jnp.sqrt(v + 1e-5) * g.reshape(1, 1, 1, -1)
                + b.reshape(1, 1, 1, -1))

    out = jax.nn.relu(bn(conv(x, w1), g1, b1))
    out = bn(conv(out, w2), g2, b2)
    y = jnp.mean(out, axis=(1, 2))
    y = jax.nn.relu(jnp.dot(y, fc1w, precision=hp) + fc1b.reshape(1, -1))
    y = jax.nn.sigmoid(jnp.dot(y, fc2w, precision=hp) + fc2b.reshape(1, -1))
    out = out * y[:, None, None, :]
    out = jax.nn.relu(x + out)
    return jnp.transpose(out, (0, 3, 1, 2))


if __name__ == "__main__":
    B, C, H, W = 2, 8, 16, 16          # inp = 8 channels (W*C = 128), SE reduction = 2
    key = jax.random.PRNGKey(0)
    ks = jax.random.split(key, 8)

    x = jax.random.normal(ks[0], (B, C, H, W), jnp.float32)

    # deterministic synthetic parameters (shapes from ResiBlock.__init__)
    w1 = jax.random.normal(ks[1], (3, 3, C, C), jnp.float32) * 0.1   # HWIO
    w2 = jax.random.normal(ks[2], (3, 3, C, C), jnp.float32) * 0.1
    g1 = jnp.ones((C,), jnp.float32)
    b1 = jnp.zeros((C,), jnp.float32)
    g2 = jnp.ones((C,), jnp.float32)
    b2 = jnp.zeros((C,), jnp.float32)
    r = C // 2
    fc1w = jax.random.normal(ks[3], (C, r), jnp.float32) * 0.2
    fc1b = jax.random.normal(ks[4], (r,), jnp.float32) * 0.1
    fc2w = jax.random.normal(ks[5], (r, C), jnp.float32) * 0.2
    fc2b = jax.random.normal(ks[6], (C,), jnp.float32) * 0.1
    params = (w1, w2, g1, b1, g2, b2, fc1w, fc1b, fc2w, fc2b)

    # One-time preparation (weight expansion + constant operators) OUTSIDE the jit.
    prep = prepare_resiblock(params, (B, C, H, W))
    prep = jax.tree_util.tree_map(jax.block_until_ready, prep)

    fwd = jax.jit(resiblock_forward_nchw)
    out = jax.block_until_ready(fwd(x, prep))

    ref = reference(x, params)
    assert out.shape == x.shape
    if not jnp.allclose(out, ref, atol=2e-4, rtol=2e-4):
        raise AssertionError(
            "mismatch vs reference, max abs diff = %g"
            % float(jnp.max(jnp.abs(out - ref))))

    print("KERNEL_OK")
</pallas_src>

<mosaic_0001>
module attributes {stable_mosaic.version = 11 : i64} {
  func.func @_resiblock_kernel(%arg0: memref<2x16x128xf32, #tpu.memory_space<vmem>>, %arg1: memref<128x384xf32, #tpu.memory_space<vmem>>, %arg2: memref<128x384xf32, #tpu.memory_space<vmem>>, %arg3: memref<1x8xf32, #tpu.memory_space<vmem>>, %arg4: memref<1x8xf32, #tpu.memory_space<vmem>>, %arg5: memref<1x8xf32, #tpu.memory_space<vmem>>, %arg6: memref<1x8xf32, #tpu.memory_space<vmem>>, %arg7: memref<8x4xf32, #tpu.memory_space<vmem>>, %arg8: memref<1x4xf32, #tpu.memory_space<vmem>>, %arg9: memref<4x8xf32, #tpu.memory_space<vmem>>, %arg10: memref<1x8xf32, #tpu.memory_space<vmem>>, %arg11: memref<128x8xf32, #tpu.memory_space<vmem>>, %arg12: memref<8x128xf32, #tpu.memory_space<vmem>>, %arg13: memref<32x32xf32, #tpu.memory_space<vmem>>, %arg14: memref<32x32xf32, #tpu.memory_space<vmem>>, %arg15: memref<2x16x128xf32, #tpu.memory_space<vmem>>) attributes {dimension_semantics = [], scalar_prefetch = 0 : i64, scratch_operands = 0 : i64, tpu.core_type = #tpu.core_type<tc>} {
    %c0 = arith.constant 0 : index
    %c0_0 = arith.constant 0 : index
    %c0_1 = arith.constant 0 : index
    %0 = vector.load %arg0[%c0, %c0_0, %c0_1] : memref<2x16x128xf32, #tpu.memory_space<vmem>>, vector<2x16x128xf32>
    %1 = vector.shape_cast %0 : vector<2x16x128xf32> to vector<32x128xf32>
    %c0_2 = arith.constant 0 : index
    %c0_3 = arith.constant 0 : index
    %2 = vector.load %arg11[%c0_2, %c0_3] : memref<128x8xf32, #tpu.memory_space<vmem>>, vector<128x8xf32>
    %c0_4 = arith.constant 0 : index
    %c0_5 = arith.constant 0 : index
    %3 = vector.load %arg12[%c0_4, %c0_5] : memref<8x128xf32, #tpu.memory_space<vmem>>, vector<8x128xf32>
    %c0_6 = arith.constant 0 : index
    %c0_7 = arith.constant 0 : index
    %4 = vector.load %arg13[%c0_6, %c0_7] : memref<32x32xf32, #tpu.memory_space<vmem>>, vector<32x32xf32>
    %c0_8 = arith.constant 0 : index
    %c0_9 = arith.constant 0 : index
    %5 = vector.load %arg14[%c0_8, %c0_9] : memref<32x32xf32, #tpu.memory_space<vmem>>, vector<32x32xf32>
    %c0_10 = arith.constant 0 : index
    %c0_11 = arith.constant 0 : index
    %6 = vector.load %arg1[%c0_10, %c0_11] : memref<128x384xf32, #tpu.memory_space<vmem>>, vector<128x384xf32>
    %cst = arith.constant dense<0.000000e+00> : vector<32x384xf32>
    %7 = tpu.matmul %1, %6, %cst {dimension_numbers = #tpu.dot_dimension_numbers<[1], [0], [0], [1], [0, 0, 1, 1], [], []>} : vector<32x128xf32>, vector<128x384xf32>, vector<32x384xf32> -> vector<32x384xf32>
    %8 = vector.extract_strided_slice %7 {offsets = [0, 0], sizes = [32, 128], strides = [1, 1]} : vector<32x384xf32> to vector<32x128xf32>
    %cst_12 = arith.constant dense<0.000000e+00> : vector<32x128xf32>
    %9 = tpu.matmul %4, %8, %cst_12 {dimension_numbers = #tpu.dot_dimension_numbers<[1], [0], [0], [1], [0, 0, 1, 1], [], []>} : vector<32x32xf32>, vector<32x128xf32>, vector<32x128xf32> -> vector<32x128xf32>
    %10 = vector.extract_strided_slice %7 {offsets = [0, 128], sizes = [32, 128], strides = [1, 1]} : vector<32x384xf32> to vector<32x128xf32>
    %11 = arith.addf %9, %10 : vector<32x128xf32>
    %12 = vector.extract_strided_slice %7 {offsets = [0, 256], sizes = [32, 128], strides = [1, 1]} : vector<32x384xf32> to vector<32x128xf32>
    %cst_13 = arith.constant dense<0.000000e+00> : vector<32x128xf32>
    %13 = tpu.matmul %5, %12, %cst_13 {dimension_numbers = #tpu.dot_dimension_numbers<[1], [0], [0], [1], [0, 0, 1, 1], [], []>} : vector<32x32xf32>, vector<32x128xf32>, vector<32x128xf32> -> vector<32x128xf32>
    %14 = arith.addf %11, %13 : vector<32x128xf32>
    %c0_14 = arith.constant 0 : index
    %c0_15 = arith.constant 0 : index
    %15 = vector.load %arg3[%c0_14, %c0_15] : memref<1x8xf32, #tpu.memory_space<vmem>>, vector<1x8xf32>
    %c0_16 = arith.constant 0 : index
    %c0_17 = arith.constant 0 : index
    %16 = vector.load %arg4[%c0_16, %c0_17] : memref<1x8xf32, #tpu.memory_space<vmem>>, vector<1x8xf32>
    %17 = arith.mulf %14, %14 : vector<32x128xf32>
    %18 = tpu.concatenate %14, %17 in 0 : vector<32x128xf32>, vector<32x128xf32> -> vector<64x128xf32>
    %cst_18 = arith.constant dense<0.000000e+00> : vector<64x8xf32>
    %19 = tpu.matmul %18, %2, %cst_18 {dimension_numbers = #tpu.dot_dimension_numbers<[1], [0], [0], [1], [0, 0, 1, 1], [], []>} : vector<64x128xf32>, vector<128x8xf32>, vector<64x8xf32> -> vector<64x8xf32>
    %20 = vector.extract_strided_slice %19 {offsets = [0, 0], sizes = [32, 8], strides = [1, 1]} : vector<64x8xf32> to vector<32x8xf32>
    %21 = vector.extract_strided_slice %19 {offsets = [32, 0], sizes = [32, 8], strides = [1, 1]} : vector<64x8xf32> to vector<32x8xf32>
    %cst_19 = arith.constant dense<0.000000e+00> : vector<8xf32>
    %22 = vector.multi_reduction <add>, %20, %cst_19 [0] : vector<32x8xf32> to vector<8xf32>
    %23 = vector.shape_cast %22 : vector<8xf32> to vector<1x8xf32>
    %cst_20 = arith.constant 0.001953125 : f32
    %24 = vector.broadcast %cst_20 : f32 to vector<1x8xf32>
    %25 = arith.mulf %23, %24 : vector<1x8xf32>
    %cst_21 = arith.constant dense<0.000000e+00> : vector<8xf32>
    %26 = vector.multi_reduction <add>, %21, %cst_21 [0] : vector<32x8xf32> to vector<8xf32>
    %27 = vector.shape_cast %26 : vector<8xf32> to vector<1x8xf32>
    %cst_22 = arith.constant 0.001953125 : f32
    %28 = vector.broadcast %cst_22 : f32 to vector<1x8xf32>
    %29 = arith.mulf %27, %28 : vector<1x8xf32>
    %30 = arith.mulf %25, %25 : vector<1x8xf32>
    %31 = arith.subf %29, %30 : vector<1x8xf32>
    %cst_23 = arith.constant 9.99999974E-6 : f32
    %32 = vector.broadcast %cst_23 : f32 to vector<1x8xf32>
    %33 = arith.addf %31, %32 : vector<1x8xf32>
    %34 = math.rsqrt %33 : vector<1x8xf32>
    %35 = arith.mulf %15, %34 : vector<1x8xf32>
    %36 = arith.mulf %25, %35 : vector<1x8xf32>
    %37 = arith.subf %16, %36 : vector<1x8xf32>
    %38 = tpu.concatenate %35, %37 in 0 : vector<1x8xf32>, vector<1x8xf32> -> vector<2x8xf32>
    %cst_24 = arith.constant dense<0.000000e+00> : vector<2x128xf32>
    %39 = tpu.matmul %38, %3, %cst_24 {dimension_numbers = #tpu.dot_dimension_numbers<[1], [0], [0], [1], [0, 0, 1, 1], [], []>} : vector<2x8xf32>, vector<8x128xf32>, vector<2x128xf32> -> vector<2x128xf32>
    %40 = vector.extract_strided_slice %39 {offsets = [0, 0], sizes = [1, 128], strides = [1, 1]} : vector<2x128xf32> to vector<1x128xf32>
    %41 = vector.broadcast %40 : vector<1x128xf32> to vector<32x128xf32>
    %42 = arith.mulf %14, %41 : vector<32x128xf32>
    %43 = vector.extract_strided_slice %39 {offsets = [1, 0], sizes = [1, 128], strides = [1, 1]} : vector<2x128xf32> to vector<1x128xf32>
    %44 = vector.broadcast %43 : vector<1x128xf32> to vector<32x128xf32>
    %45 = arith.addf %42, %44 : vector<32x128xf32>
    %cst_25 = arith.constant 0.000000e+00 : f32
    %46 = vector.broadcast %cst_25 : f32 to vector<32x128xf32>
    %47 = arith.maximumf %45, %46 : vector<32x128xf32>
    %c0_26 = arith.constant 0 : index
    %c0_27 = arith.constant 0 : index
    %48 = vector.load %arg2[%c0_26, %c0_27] : memref<128x384xf32, #tpu.memory_space<vmem>>, vector<128x384xf32>
    %cst_28 = arith.constant dense<0.000000e+00> : vector<32x384xf32>
    %49 = tpu.matmul %47, %48, %cst_28 {dimension_numbers = #tpu.dot_dimension_numbers<[1], [0], [0], [1], [0, 0, 1, 1], [], []>} : vector<32x128xf32>, vector<128x384xf32>, vector<32x384xf32> -> vector<32x384xf32>
    %50 = vector.extract_strided_slice %49 {offsets = [0, 0], sizes = [32, 128], strides = [1, 1]} : vector<32x384xf32> to vector<32x128xf32>
    %cst_29 = arith.constant dense<0.000000e+00> : vector<32x128xf32>
    %51 = tpu.matmul %4, %50, %cst_29 {dimension_numbers = #tpu.dot_dimension_numbers<[1], [0], [0], [1], [0, 0, 1, 1], [], []>} : vector<32x32xf32>, vector<32x128xf32>, vector<32x128xf32> -> vector<32x128xf32>
    %52 = vector.extract_strided_slice %49 {offsets = [0, 128], sizes = [32, 128], strides = [1, 1]} : vector<32x384xf32> to vector<32x128xf32>
    %53 = arith.addf %51, %52 : vector<32x128xf32>
    %54 = vector.extract_strided_slice %49 {offsets = [0, 256], sizes = [32, 128], strides = [1, 1]} : vector<32x384xf32> to vector<32x128xf32>
    %cst_30 = arith.constant dense<0.000000e+00> : vector<32x128xf32>
    %55 = tpu.matmul %5, %54, %cst_30 {dimension_numbers = #tpu.dot_dimension_numbers<[1], [0], [0], [1], [0, 0, 1, 1], [], []>} : vector<32x32xf32>, vector<32x128xf32>, vector<32x128xf32> -> vector<32x128xf32>
    %56 = arith.addf %53, %55 : vector<32x128xf32>
    %c0_31 = arith.constant 0 : index
    %c0_32 = arith.constant 0 : index
    %57 = vector.load %arg5[%c0_31, %c0_32] : memref<1x8xf32, #tpu.memory_space<vmem>>, vector<1x8xf32>
    %c0_33 = arith.constant 0 : index
    %c0_34 = arith.constant 0 : index
    %58 = vector.load %arg6[%c0_33, %c0_34] : memref<1x8xf32, #tpu.memory_space<vmem>>, vector<1x8xf32>
    %59 = arith.mulf %56, %56 : vector<32x128xf32>
    %60 = tpu.concatenate %56, %59 in 0 : vector<32x128xf32>, vector<32x128xf32> -> vector<64x128xf32>
    %cst_35 = arith.constant dense<0.000000e+00> : vector<64x8xf32>
    %61 = tpu.matmul %60, %2, %cst_35 {dimension_numbers = #tpu.dot_dimension_numbers<[1], [0], [0], [1], [0, 0, 1, 1], [], []>} : vector<64x128xf32>, vector<128x8xf32>, vector<64x8xf32> -> vector<64x8xf32>
    %62 = vector.extract_strided_slice %61 {offsets = [0, 0], sizes = [32, 8], strides = [1, 1]} : vector<64x8xf32> to vector<32x8xf32>
    %63 = vector.extract_strided_slice %61 {offsets = [32, 0], sizes = [32, 8], strides = [1, 1]} : vector<64x8xf32> to vector<32x8xf32>
    %cst_36 = arith.constant dense<0.000000e+00> : vector<8xf32>
    %64 = vector.multi_reduction <add>, %62, %cst_36 [0] : vector<32x8xf32> to vector<8xf32>
    %65 = vector.shape_cast %64 : vector<8xf32> to vector<1x8xf32>
    %cst_37 = arith.constant 0.001953125 : f32
    %66 = vector.broadcast %cst_37 : f32 to vector<1x8xf32>
    %67 = arith.mulf %65, %66 : vector<1x8xf32>
    %cst_38 = arith.constant dense<0.000000e+00> : vector<8xf32>
    %68 = vector.multi_reduction <add>, %63, %cst_38 [0] : vector<32x8xf32> to vector<8xf32>
    %69 = vector.shape_cast %68 : vector<8xf32> to vector<1x8xf32>
    %cst_39 = arith.constant 0.001953125 : f32
    %70 = vector.broadcast %cst_39 : f32 to vector<1x8xf32>
    %71 = arith.mulf %69, %70 : vector<1x8xf32>
    %72 = arith.mulf %67, %67 : vector<1x8xf32>
    %73 = arith.subf %71, %72 : vector<1x8xf32>
    %cst_40 = arith.constant 9.99999974E-6 : f32
    %74 = vector.broadcast %cst_40 : f32 to vector<1x8xf32>
    %75 = arith.addf %73, %74 : vector<1x8xf32>
    %76 = math.rsqrt %75 : vector<1x8xf32>
    %77 = arith.mulf %57, %76 : vector<1x8xf32>
    %78 = arith.mulf %67, %77 : vector<1x8xf32>
    %79 = arith.subf %58, %78 : vector<1x8xf32>
    %80 = tpu.concatenate %77, %79 in 0 : vector<1x8xf32>, vector<1x8xf32> -> vector<2x8xf32>
    %cst_41 = arith.constant dense<0.000000e+00> : vector<2x128xf32>
    %81 = tpu.matmul %80, %3, %cst_41 {dimension_numbers = #tpu.dot_dimension_numbers<[1], [0], [0], [1], [0, 0, 1, 1], [], []>} : vector<2x8xf32>, vector<8x128xf32>, vector<2x128xf32> -> vector<2x128xf32>
    %82 = vector.extract_strided_slice %81 {offsets = [0, 0], sizes = [1, 128], strides = [1, 1]} : vector<2x128xf32> to vector<1x128xf32>
    %83 = vector.broadcast %82 : vector<1x128xf32> to vector<32x128xf32>
    %84 = arith.mulf %56, %83 : vector<32x128xf32>
    %85 = vector.extract_strided_slice %81 {offsets = [1, 0], sizes = [1, 128], strides = [1, 1]} : vector<2x128xf32> to vector<1x128xf32>
    %86 = vector.broadcast %85 : vector<1x128xf32> to vector<32x128xf32>
    %87 = arith.addf %84, %86 : vector<32x128xf32>
    %88 = vector.shape_cast %62 : vector<32x8xf32> to vector<2x16x8xf32>
    %cst_42 = arith.constant dense<0.000000e+00> : vector<2x8xf32>
    %89 = vector.multi_reduction <add>, %88, %cst_42 [1] : vector<2x16x8xf32> to vector<2x8xf32>
    %cst_43 = arith.constant 3.906250e-03 : f32
    %90 = vector.broadcast %cst_43 : f32 to vector<2x8xf32>
    %91 = arith.mulf %89, %90 : vector<2x8xf32>
    %92 = vector.broadcast %77 : vector<1x8xf32> to vector<2x8xf32>
    %93 = arith.mulf %91, %92 : vector<2x8xf32>
    %94 = vector.broadcast %79 : vector<1x8xf32> to vector<2x8xf32>
    %95 = arith.addf %93, %94 : vector<2x8xf32>
    %c0_44 = arith.constant 0 : index
    %c0_45 = arith.constant 0 : index
    %96 = vector.load %arg7[%c0_44, %c0_45] : memref<8x4xf32, #tpu.memory_space<vmem>>, vector<8x4xf32>
    %cst_46 = arith.constant dense<0.000000e+00> : vector<2x4xf32>
    %97 = tpu.matmul %95, %96, %cst_46 {dimension_numbers = #tpu.dot_dimension_numbers<[1], [0], [0], [1], [0, 0, 1, 1], [], []>} : vector<2x8xf32>, vector<8x4xf32>, vector<2x4xf32> -> vector<2x4xf32>
    %c0_47 = arith.constant 0 : index
    %c0_48 = arith.constant 0 : index
    %98 = vector.load %arg8[%c0_47, %c0_48] : memref<1x4xf32, #tpu.memory_space<vmem>>, vector<1x4xf32>
    %99 = vector.broadcast %98 : vector<1x4xf32> to vector<2x4xf32>
    %100 = arith.addf %97, %99 : vector<2x4xf32>
    %cst_49 = arith.constant 0.000000e+00 : f32
    %101 = vector.broadcast %cst_49 : f32 to vector<2x4xf32>
    %102 = arith.maximumf %100, %101 : vector<2x4xf32>
    %c0_50 = arith.constant 0 : index
    %c0_51 = arith.constant 0 : index
    %103 = vector.load %arg9[%c0_50, %c0_51] : memref<4x8xf32, #tpu.memory_space<vmem>>, vector<4x8xf32>
    %cst_52 = arith.constant dense<0.000000e+00> : vector<2x8xf32>
    %104 = tpu.matmul %102, %103, %cst_52 {dimension_numbers = #tpu.dot_dimension_numbers<[1], [0], [0], [1], [0, 0, 1, 1], [], []>} : vector<2x4xf32>, vector<4x8xf32>, vector<2x8xf32> -> vector<2x8xf32>
    %c0_53 = arith.constant 0 : index
    %c0_54 = arith.constant 0 : index
    %105 = vector.load %arg10[%c0_53, %c0_54] : memref<1x8xf32, #tpu.memory_space<vmem>>, vector<1x8xf32>
    %106 = vector.broadcast %105 : vector<1x8xf32> to vector<2x8xf32>
    %107 = arith.addf %104, %106 : vector<2x8xf32>
    %108 = arith.negf %107 : vector<2x8xf32>
    %109 = math.exp %108 : vector<2x8xf32>
    %cst_55 = arith.constant 1.000000e+00 : f32
    %110 = vector.broadcast %cst_55 : f32 to vector<2x8xf32>
    %111 = arith.addf %110, %109 : vector<2x8xf32>
    %112 = arith.divf %110, %111 : vector<2x8xf32>
    %cst_56 = arith.constant dense<0.000000e+00> : vector<2x128xf32>
    %113 = tpu.matmul %112, %3, %cst_56 {dimension_numbers = #tpu.dot_dimension_numbers<[1], [0], [0], [1], [0, 0, 1, 1], [], []>} : vector<2x8xf32>, vector<8x128xf32>, vector<2x128xf32> -> vector<2x128xf32>
    %114 = vector.shape_cast %87 : vector<32x128xf32> to vector<2x16x128xf32>
    %115 = vector.shape_cast %113 : vector<2x128xf32> to vector<2x1x128xf32>
    %116 = vector.broadcast %115 : vector<2x1x128xf32> to vector<2x16x128xf32>
    %117 = arith.mulf %114, %116 : vector<2x16x128xf32>
    %118 = arith.addf %0, %117 : vector<2x16x128xf32>
    %cst_57 = arith.constant 0.000000e+00 : f32
    %119 = vector.broadcast %cst_57 : f32 to vector<2x16x128xf32>
    %120 = arith.maximumf %118, %119 : vector<2x16x128xf32>
    %c0_58 = arith.constant 0 : index
    %c0_59 = arith.constant 0 : index
    %c0_60 = arith.constant 0 : index
    %121 = vector.load %arg15[%c0_58, %c0_59, %c0_60] : memref<2x16x128xf32, #tpu.memory_space<vmem>>, vector<2x16x128xf32>
    tpu.vector_store %arg15[%c0_58, %c0_59, %c0_60], %120 {strides = array<i32>} : memref<2x16x128xf32, #tpu.memory_space<vmem>>, vector<2x16x128xf32>,
    return
  }
}

</mosaic_0001>

<bundles_post_ra>
// kernel: resiblock_forward_nchw.1
= control target key start
LH: loop header
LB: loop body
LE: loop exit
PB: predicated region body
PF: predicated region fallthrough
CT: control target
= control target key end

     0   :  { %v2354_v3 = vmov 0.0   ;;  %vm301_vm0 = vcmask 261120   ;;  %vm2355_vm1 = vmmov 0   ;;  %vm611_vm2 = vcmask 64512   ;;  %s3072_s1 = inlined_call_operand.vmem [shape: f32[128,384], index: 1, kind: input, shape index: {}]   ;;  %s3073_s0 = inlined_call_operand.vmem [shape: f32[2,16,128], index: 0, kind: input, shape index: {}]   ;;  %s3074_s13 = inlined_call_operand.vmem [shape: f32[32,32], index: 13, kind: input, shape index: {}]   ;;  %s3075_s11 = inlined_call_operand.vmem [shape: f32[128,8], index: 11, kind: input, shape index: {}]   ;;  %s3076_s14 = inlined_call_operand.vmem [shape: f32[32,32], index: 14, kind: input, shape index: {}]   ;;  %s3077_s12 = inlined_call_operand.vmem [shape: f32[8,128], index: 12, kind: input, shape index: {}]   ;;  %s3078_s2 = inlined_call_operand.vmem [shape: f32[128,384], index: 2, kind: input, shape index: {}]   ;;  %s3079_s3 = inlined_call_operand.vmem [shape: f32[1,8], index: 3, kind: input, shape index: {}]   ;;  %s3080_s4 = inlined_call_operand.vmem [shape: f32[1,8], index: 4, kind: input, shape index: {}]   ;;  %s3081_s5 = inlined_call_operand.vmem [shape: f32[1,8], index: 5, kind: input, shape index: {}]   ;;  %s3082_s6 = inlined_call_operand.vmem [shape: f32[1,8], index: 6, kind: input, shape index: {}]   ;;  %s3083_s7 = inlined_call_operand.vmem [shape: f32[8,4], index: 7, kind: input, shape index: {}]   ;;  %s3084_s9 = inlined_call_operand.vmem [shape: f32[4,8], index: 9, kind: input, shape index: {}]   ;;  %s3085_s8 = inlined_call_operand.vmem [shape: f32[1,4], index: 8, kind: input, shape index: {}]   ;;  %s3086_s10 = inlined_call_operand.vmem [shape: f32[1,8], index: 10, kind: input, shape index: {}]   ;;  %s3087_s15 = inlined_call_operand.vmem [shape: f32[2,16,128], index: 15, kind: output, shape index: {}]  }
   0x1   :  { %v80_v0 = vld [vmem:[%s3072_s1 + $0x8] sm:$0xff]  ;;  %v83_v1 = vld [vmem:[%s3072_s1 + $0x20] sm:$0xff]  ;;  %191 = vmatprep.mubr.f32.mxu0 %v2354_v3  ;;  %v82_v5 = vld [vmem:[%s3072_s1 + $0x18] sm:$0xff]  ;;  %vm653_vm3 = vcmask 1040384   ;;  %vm1422_vm4 = vcmask 1041409   ;;  %vm1509_vm5 = vcmask 1043456  }
   0x2   :  { %v79_v2 = vld [vmem:[%s3072_s1] sm:$0xff]  ;;  %v2115_v4 = vpack.c.bf16 %v83_v1, %v80_v0  ;;  %v86_v6 = vld [vmem:[%s3072_s1 + $0x38] sm:$0xff]  ;;  %v89_v7 = vld [vmem:[%s3072_s1 + $0x50] sm:$0xff]  ;;  %vm1505_vm6 = vcmask 31744  }
   0x3   :  { %v2117_v8 = vpack.c.bf16 %v82_v5, %v79_v2  ;;  %v2119_v9 = vpack.c.bf16 %v89_v7, %v86_v6  ;;  %v85_v10 = vld [vmem:[%s3072_s1 + $0x30] sm:$0xff]  ;;  %v88_v11 = vld [vmem:[%s3072_s1 + $0x48] sm:$0xff]  ;;  %v95_v13 = vld [vmem:[%s3072_s1 + $0x80] sm:$0xff] }
   0x4   :  { %v92_v12 = vld [vmem:[%s3072_s1 + $0x68] sm:$0xff]  ;;  %2116 = vmatprep.subr.bf16.mxu0 %v2115_v4  ;;  %v2121_v14 = vpack.c.bf16 %v88_v11, %v85_v10  ;;  %v91_v15 = vld [vmem:[%s3072_s1 + $0x60] sm:$0xff]  ;;  %v94_v17 = vld [vmem:[%s3072_s1 + $0x78] sm:$0xff] }
   0x5   :  { %2118 = vmatpush1.bf16.msra.mxu0 %v2117_v8  ;;  %v2123_v16 = vpack.c.bf16 %v95_v13, %v92_v12  ;;  %v81_v18 = vld [vmem:[%s3072_s1 + $0x10] sm:$0xff]  ;;  %v84_v19 = vld [vmem:[%s3072_s1 + $0x28] sm:$0xff]  ;;  %v98_v20 = vld [vmem:[%s3072_s1 + $0x98] sm:$0xff]  ;;  %v2125_v25 = vpack.c.bf16 %v94_v17, %v91_v15 }
   0x6   :  { %2120 = vmatprep.subr.bf16.mxu0 %v2119_v9  ;;  %v101_v21 = vld [vmem:[%s3072_s1 + $0xb0] sm:$0xff]  ;;  %v2147_v22 = vpack.c.bf16 %v84_v19, %v81_v18  ;;  %v87_v23 = vld [vmem:[%s3072_s1 + $0x40] sm:$0xff]  ;;  %v90_v24 = vld [vmem:[%s3072_s1 + $0x58] sm:$0xff] }
   0x7   :  { %v97_v26 = vld [vmem:[%s3072_s1 + $0x90] sm:$0xff]  ;;  %v2151_v27 = vpack.c.bf16 %v90_v24, %v87_v23  ;;  %v2127_v28 = vpack.c.bf16 %v101_v21, %v98_v20  ;;  %v100_v29 = vld [vmem:[%s3072_s1 + $0xa8] sm:$0xff]  ;;  %v107_v33 = vld [vmem:[%s3072_s1 + $0xe0] sm:$0xff] }
   0x8   :  { %2148 = vmatprep.subr.bf16.mxu1 %v2147_v22  ;;  %v93_v30 = vld [vmem:[%s3072_s1 + $0x70] sm:$0xff]  ;;  %v96_v31 = vld [vmem:[%s3072_s1 + $0x88] sm:$0xff]  ;;  %v99_v35 = vld [vmem:[%s3072_s1 + $0xa0] sm:$0xff]  ;;  %v2129_v37 = vpack.c.bf16 %v100_v29, %v97_v26 }
   0x9   :  { %2122 = vmatpush1.bf16.msra.mxu0 %v2121_v14  ;;  %2150 = vmatpush3.bf16.msra.mxu1 %v2147_v22  ;;  %v104_v32 = vld [vmem:[%s3072_s1 + $0xc8] sm:$0xff]  ;;  %v2155_v34 = vpack.c.bf16 %v96_v31, %v93_v30  ;;  %v102_v36 = vld [vmem:[%s3072_s1 + $0xb8] sm:$0xff]  ;;  %v103_v39 = vld [vmem:[%s3072_s1 + $0xc0] sm:$0xff] }
   0xa   :  { %2124 = vmatprep.subr.bf16.mxu0 %v2123_v16  ;;  %2152 = vmatprep.subr.bf16.mxu1 %v2151_v27  ;;  %v2131_v38 = vpack.c.bf16 %v107_v33, %v104_v32  ;;  %v106_v40 = vld [vmem:[%s3072_s1 + $0xd8] sm:$0xff]  ;;  %v113_v42 = vld [vmem:[%s3072_s1 + $0x110] sm:$0xff]  ;;  %v2159_v43 = vpack.c.bf16 %v102_v36, %v99_v35  ;;  %v50_v44 = vld [vmem:[%s3073_s0] sm:$0xff] }
   0xb   :  { %v110_v41 = vld [vmem:[%s3072_s1 + $0xf8] sm:$0xff]  ;;  %v105_v45 = vld [vmem:[%s3072_s1 + $0xd0] sm:$0xff]  ;;  %v108_v46 = vld [vmem:[%s3072_s1 + $0xe8] sm:$0xff]  ;;  %1902 = vmatprep.mubr.f32.mxu1 %v50_v44  ;;  %v2133_v47 = vpack.c.bf16 %v106_v40, %v103_v39 }
   0xc   :  { %v2135_v48 = vpack.c.bf16 %v113_v42, %v110_v41  ;;  %v109_v49 = vld [vmem:[%s3072_s1 + $0xf0] sm:$0xff]  ;;  %v112_v50 = vld [vmem:[%s3072_s1 + $0x108] sm:$0xff]  ;;  %v119_v52 = vld [vmem:[%s3072_s1 + $0x140] sm:$0xff]  ;;  %v2163_v53 = vpack.c.bf16 %v108_v46, %v105_v45 }
   0xd   :  { %2126 = vmatpush1.bf16.msra.mxu0 %v2125_v25  ;;  %2154 = vmatpush3.bf16.msra.mxu1 %v2151_v27  ;;  %v116_v51 = vld [vmem:[%s3072_s1 + $0x128] sm:$0xff]  ;;  %v111_v54 = vld [vmem:[%s3072_s1 + $0x100] sm:$0xff]  ;;  %v114_v55 = vld [vmem:[%s3072_s1 + $0x118] sm:$0xff]  ;;  %v2137_v56 = vpack.c.bf16 %v112_v50, %v109_v49 }
   0xe   :  { %2128 = vmatprep.subr.bf16.mxu0 %v2127_v28  ;;  %2156 = vmatprep.subr.bf16.mxu1 %v2155_v34  ;;  %v2139_v57 = vpack.c.bf16 %v119_v52, %v116_v51  ;;  %v115_v58 = vld [vmem:[%s3072_s1 + $0x120] sm:$0xff]  ;;  %v118_v59 = vld [vmem:[%s3072_s1 + $0x138] sm:$0xff]  ;;  %v125_v61 = vld [vmem:[%s3072_s1 + $0x170] sm:$0xff]  ;;  %v2167_v62 = vpack.c.bf16 %v114_v55, %v111_v54 }
   0xf   :  { %v122_v60 = vld [vmem:[%s3072_s1 + $0x158] sm:$0xff]  ;;  %v117_v63 = vld [vmem:[%s3072_s1 + $0x130] sm:$0xff]  ;;  %v120_v0 = vld [vmem:[%s3072_s1 + $0x148] sm:$0xff]  ;;  %v2141_v1 = vpack.c.bf16 %v118_v59, %v115_v58 }
  0x10   :  { %v2143_v2 = vpack.c.bf16 %v125_v61, %v122_v60  ;;  %v121_v4 = vld [vmem:[%s3072_s1 + $0x150] sm:$0xff]  ;;  %v124_v5 = vld [vmem:[%s3072_s1 + $0x168] sm:$0xff]  ;;  %v2171_v6 = vpack.c.bf16 %v120_v0, %v117_v63  ;;  %v123_v7 = vld [vmem:[%s3072_s1 + $0x160] sm:$0xff] }
  0x11   :  { %2130 = vmatpush1.bf16.msra.mxu0 %v2129_v37  ;;  %2158 = vmatpush3.bf16.msra.mxu1 %v2155_v34  ;;  %v126_v8 = vld [vmem:[%s3072_s1 + $0x178] sm:$0xff]  ;;  %v2145_v9 = vpack.c.bf16 %v124_v5, %v121_v4  ;;  %v51_v11 = vld [vmem:[%s3073_s0 + $0x8] sm:$0xff]  ;;  %v52_v12 = vld [vmem:[%s3073_s0 + $0x10] sm:$0xff] }
  0x12   :  { %2132 = vmatprep.subr.bf16.mxu0 %v2131_v38  ;;  %2160 = vmatprep.subr.bf16.mxu1 %v2159_v43  ;;  %v2175_v10 = vpack.c.bf16 %v126_v8, %v123_v7  ;;  %v53_v13 = vld [vmem:[%s3073_s0 + $0x18] sm:$0xff]  ;;  %v2600_v14 = vld [vmem:[%s3074_s13] sm:$0xff]  ;;  %v55_v16 = vld [vmem:[%s3075_s11 + $0x8] sm:$0xff] }
  0x13   :  { %v54_v15 = vld [vmem:[%s3075_s11] sm:$0xff]  ;;  %v56_v17 = vld [vmem:[%s3075_s11 + $0x10] sm:$0xff]  ;;  %v57_v19 = vld [vmem:[%s3075_s11 + $0x18] sm:$0xff] }
  0x14   :  { %v2613_v18 = vpack.c.bf16 %v55_v16, %v54_v15  ;;  %v2618_v20 = vpack.c.bf16 %v57_v19, %v56_v17  ;;  %v58_v21 = vld [vmem:[%s3075_s11 + $0x20] sm:$0xff]  ;;  %v59_v22 = vld [vmem:[%s3075_s11 + $0x28] sm:$0xff]  ;;  %v60_v24 = vld [vmem:[%s3075_s11 + $0x30] sm:$0xff] }
  0x15   :  { %2134 = vmatpush1.bf16.msra.mxu0 %v2133_v47  ;;  %2162 = vmatpush3.bf16.msra.mxu1 %v2159_v43  ;;  %v2629_v23 = vpack.c.bf16 %v59_v22, %v58_v21  ;;  %v61_v25 = vld [vmem:[%s3075_s11 + $0x38] sm:$0xff]  ;;  %v62_v27 = vld [vmem:[%s3075_s11 + $0x40] sm:$0xff]  ;;  %v63_v28 = vld [vmem:[%s3075_s11 + $0x48] sm:$0xff] }
  0x16   :  { %2136 = vmatprep.subr.bf16.mxu0 %v2135_v48  ;;  %2164 = vmatprep.subr.bf16.mxu1 %v2163_v53  ;;  %v2639_v26 = vpack.c.bf16 %v61_v25, %v60_v24  ;;  %v2649_v29 = vpack.c.bf16 %v63_v28, %v62_v27  ;;  %v2657_v46 = vld [vmem:[%s3074_s13 + $0x8] sm:$0xff]  ;;  %v2662_v47 = vld [vmem:[%s3074_s13 + $0x10] sm:$0xff]  ;;  %v2671_v48 = vld [vmem:[%s3074_s13 + $0x18] sm:$0xff] }
  0x17   :  { %v2676_v49 = vld [vmem:[%s3076_s14] sm:$0xff]  ;;  %v2685_v50 = vld [vmem:[%s3076_s14 + $0x8] sm:$0xff]  ;;  %v2690_v51 = vld [vmem:[%s3076_s14 + $0x10] sm:$0xff] }
  0x18   :  { %v2700_v52 = vld [vmem:[%s3076_s14 + $0x18] sm:$0xff]  ;;  %v68_v59 = vld [vmem:[%s3075_s11 + $0x70] sm:$0xff]  ;;  %v2757_v22 = vld [vmem:[%s3077_s12] sm:$0xff] }
  0x19   :  { %2138 = vmatpush1.bf16.msra.mxu0 %v2137_v56  ;;  %2166 = vmatpush3.bf16.msra.mxu1 %v2163_v53  ;;  %v64_v53 = vld [vmem:[%s3075_s11 + $0x50] sm:$0xff]  ;;  %v65_v54 = vld [vmem:[%s3075_s11 + $0x58] sm:$0xff]  ;;  %v66_v56 = vld [vmem:[%s3075_s11 + $0x60] sm:$0xff] }
  0x1a   :  { %2140 = vmatprep.subr.bf16.mxu0 %v2139_v57  ;;  %2168 = vmatprep.subr.bf16.mxu1 %v2167_v62  ;;  %v2710_v55 = vpack.c.bf16 %v65_v54, %v64_v53  ;;  %v67_v57 = vld [vmem:[%s3075_s11 + $0x68] sm:$0xff]  ;;  %v69_v60 = vld [vmem:[%s3075_s11 + $0x78] sm:$0xff]  ;;  %v752_v25 = vld [vmem:[%s3078_s2 + $0x20] sm:$0xff] }
  0x1b   :  { %v2720_v58 = vpack.c.bf16 %v67_v57, %v66_v56  ;;  %v2730_v61 = vpack.c.bf16 %v69_v60, %v68_v59  ;;  %v749_v24 = vld [vmem:[%s3078_s2 + $0x8] sm:$0xff]  ;;  %v750_v28 = vld [vmem:[%s3078_s2 + $0x10] sm:$0xff] }
  0x1c   :  { %v2227_v27 = vpack.c.bf16 %v752_v25, %v749_v24 }
  0x1d   :  { %2142 = vmatpush1.bf16.msra.mxu0 %v2141_v1  ;;  %2170 = vmatpush3.bf16.msra.mxu1 %v2167_v62 }
  0x1e   :  { %2144 = vmatprep.subr.bf16.mxu0 %v2143_v2  ;;  %2172 = vmatprep.subr.bf16.mxu1 %v2171_v6 }
  0x21   :  { %2146 = vmatpush1.bf16.msra.mxu0 %v2145_v9  ;;  %2174 = vmatpush3.bf16.msra.mxu1 %v2171_v6 }
  0x22   :  { %2176 = vmatprep.subr.bf16.mxu1 %v2175_v10 }
  0x24   :  { %192 = vmatmul.mubr.f32.vlgmr.msra.gmra.mrb[0].mxu0 %v50_v44 }
  0x25   :  { %197 = vmatprep.mubr.f32.mxu0 %v2354_v3  ;;  %2178 = vmatpush3.bf16.msra.mxu1 %v2175_v10 }
  0x26   :  { %2196 = vmatprep.subr.bf16.mxu1 %v2613_v18 }
  0x28   :  { %198 = vmatmul.mubr.f32.gmra.mrb[2].mxu0 %v51_v11  ;;  %1903 = vmatmul.mubr.f32.vlgmr.msra.gmra.mrb[0].mxu1 %v51_v11 }
  0x29   :  { %203 = vmatprep.mubr.f32.mxu0 %v2354_v3  ;;  %1905 = vmatprep.mubr.f32.mxu1 %v52_v12 }
  0x2a   :  { %2198 = vmatpush3.bf16.msra.mxu1 %v2613_v18 }
  0x2b   :  { %2200 = vmatprep.subr.bf16.mxu1 %v2618_v20 }
  0x2c   :  { %204 = vmatmul.mubr.f32.gmra.mrb[4].mxu0 %v52_v12  ;;  %1906 = vmatmul.mubr.f32.gmra.mrb[2].mxu1 %v53_v13 }
  0x2d   :  { %209 = vmatprep.mubr.f32.mxu0 %v2354_v3 }
  0x2e   :  { %2202 = vmatpush3.bf16.msra.mxu1 %v2618_v20 }
  0x2f   :  { %2204 = vmatprep.subr.bf16.mxu1 %v2629_v23 }
  0x30   :  { %210 = vmatmul.mubr.f32.gmra.mrb[6].mxu0 %v53_v13 }
  0x31   :  { %1916 = vmatprep.mubr.msk.f32.mxu0 %vm301_vm0, %v2600_v14 }
  0x32   :  { %2206 = vmatpush3.bf16.msra.mxu1 %v2629_v23 }
  0x33   :  { %2208 = vmatprep.subr.bf16.mxu1 %v2639_v26 }
  0x36   :  { %2210 = vmatpush3.bf16.msra.mxu1 %v2639_v26 }
  0x37   :  { %2212 = vmatprep.subr.bf16.mxu1 %v2649_v29 }
  0x3a   :  { %2214 = vmatpush3.bf16.msra.mxu1 %v2649_v29 }
  0x3b   :  { %2216 = vmatprep.subr.bf16.mxu1 %v2710_v55 }
  0x3e   :  { %2218 = vmatpush3.bf16.msra.mxu1 %v2710_v55 }
  0x3f   :  { %2220 = vmatprep.subr.bf16.mxu1 %v2720_v58 }
  0x42   :  { %2222 = vmatpush3.bf16.msra.mxu1 %v2720_v58 }
  0x43   :  { %2224 = vmatprep.subr.bf16.mxu1 %v2730_v61 }
  0x46   :  { %2226 = vmatpush3.bf16.msra.mxu1 %v2730_v61 }
  0xf7   :  { %v193_v30 = vpop.f32.mrb[0].mxu0 }
  0xf8   :  { %v195_v31 = vpop.f32.mrb[1].mxu0 }
  0xfb   :  { %v199_v32 = vpop.f32.mrb[2].mxu0  ;;  %v1904_v35 = vpop.f32.mrb[0].mxu1 }
  0xfc   :  { %v2179_v33 = vpack.c.bf16 %v199_v32, %v193_v30  ;;  %v201_v34 = vpop.f32.mrb[3].mxu0  ;;  %v282_v36 = vpop.f32.mrb[1].mxu1  ;;  %v753_v30 = vld [vmem:[%s3078_s2 + $0x28] sm:$0xff]  ;;  %v756_v32 = vld [vmem:[%s3078_s2 + $0x40] sm:$0xff] }
  0xfd   :  { %v2187_v37 = vpack.c.bf16 %v1904_v35, %v282_v36  ;;  %v762_v35 = vld [vmem:[%s3078_s2 + $0x70] sm:$0xff]  ;;  %v765_v36 = vld [vmem:[%s3078_s2 + $0x88] sm:$0xff] }
  0xfe   :  { %2180 = vmatprep.subr.bf16.mxu0 %v2179_v33 }
  0xff   :  { %v205_v38 = vpop.f32.mrb[4].mxu0  ;;  %2182 = vmatpush3.bf16.msra.mxu0 %v2179_v33  ;;  %v1907_v40 = vpop.f32.mrb[2].mxu1  ;;  %v759_v33 = vld [vmem:[%s3078_s2 + $0x58] sm:$0xff] }
 0x100   :  { %v207_v39 = vpop.f32.mrb[5].mxu0  ;;  %v292_v41 = vpop.f32.mrb[3].mxu1 }
 0x101   :  { %v2191_v42 = vpack.c.bf16 %v1907_v40, %v292_v41  ;;  %v774_v41 = vld [vmem:[%s3078_s2 + $0xd0] sm:$0xff] }
 0x103   :  { %v211_v43 = vpop.f32.mrb[6].mxu0 }
 0x104   :  { %v2183_v44 = vpack.c.bf16 %v211_v43, %v205_v38  ;;  %v213_v45 = vpop.f32.mrb[7].mxu0  ;;  %v768_v38 = vld [vmem:[%s3078_s2 + $0xa0] sm:$0xff] }
 0x106   :  { %2184 = vmatprep.subr.bf16.mxu0 %v2183_v44 }
 0x107   :  { %2186 = vmatpush3.bf16.msra.mxu0 %v2183_v44  ;;  %v780_v44 = vld [vmem:[%s3078_s2 + $0x100] sm:$0xff] }
 0x108   :  { %2188 = vmatprep.subr.bf16.mxu0 %v2187_v37 }
 0x10a   :  { %1917 = vmatmul.mubr.msk.f32.vlgmr.msra.gmra.mrb[8].mxu0 %vm301_vm0, %v2657_v46 }
 0x10b   :  { %2190 = vmatpush3.bf16.msra.mxu0 %v2187_v37  ;;  %1919 = vmatprep.mubr.msk.f32.mxu0 %vm301_vm0, %v2662_v47  ;;  %v2267_v37 = vpack.c.bf16 %v765_v36, %v762_v35 }
 0x10c   :  { %2192 = vmatprep.subr.bf16.mxu0 %v2191_v42 }
 0x10e   :  { %1920 = vmatmul.mubr.msk.f32.gmra.mrb[10].mxu0 %vm301_vm0, %v2671_v48 }
 0x10f   :  { %2194 = vmatpush3.bf16.msra.mxu0 %v2191_v42  ;;  %1930 = vmatprep.mubr.msk.f32.mxu0 %vm301_vm0, %v2676_v49  ;;  %v777_v42 = vld [vmem:[%s3078_s2 + $0xe8] sm:$0xff] }
 0x110   :  { %1980 = vmatprep.subr.mxu0 %v2354_v3  ;;  %v2275_v43 = vpack.c.bf16 %v777_v42, %v774_v41 }
 0x112   :  { %1931 = vmatmul.mubr.msk.f32.vlgmr.msra.gmra.mrb[12].mxu0 %vm301_vm0, %v2685_v50 }
 0x113   :  { %1933 = vmatprep.mubr.msk.f32.mxu0 %vm301_vm0, %v2690_v51  ;;  %1981 = vmatpush3.msra.mxu0 %v2757_v22 }
 0x114   :  { %2228 = vmatprep.subr.bf16.mxu0 %v2227_v27 }
 0x116   :  { %1934 = vmatmul.mubr.msk.f32.gmra.mrb[14].mxu0 %vm301_vm0, %v2700_v52 }
 0x117   :  { %1982 = vmatprep.mubr.msk.f32.mxu0 %vm2355_vm1, %v2354_v3 }
 0x1dd   :  { %v1918_v62 = vpop.f32.mrb[8].mxu0 }
 0x1de   :  { %v386_v63 = vadd.f32 %v1918_v62, %v201_v34  ;;  %v380_v0 = vpop.f32.mrb[9].mxu0  ;;  %v2263_v34 = vpack.c.bf16 %v759_v33, %v756_v32 }
 0x1df   :  { %v381_v1 = vadd.f32 %v380_v0, %v195_v31  ;;  %v2259_v31 = vpack.c.bf16 %v753_v30, %v750_v28 }
 0x1e1   :  { %v1921_v2 = vpop.f32.mrb[10].mxu0  ;;  %2260 = vmatprep.subr.bf16.mxu1 %v2259_v31 }
 0x1e2   :  { %v396_v4 = vadd.f32 %v1921_v2, %v213_v45  ;;  %v390_v5 = vpop.f32.mrb[11].mxu0  ;;  %v783_v45 = vld [vmem:[%s3078_s2 + $0x118] sm:$0xff] }
 0x1e3   :  { %v391_v6 = vadd.f32 %v390_v5, %v207_v39  ;;  %v771_v39 = vld [vmem:[%s3078_s2 + $0xb8] sm:$0xff]  ;;  %v2279_v53 = vpack.c.bf16 %v783_v45, %v780_v44  ;;  %v648_v44 = vlaneseq  ;;  %v500_v45 = vld [vmem:[%s3079_s3] sm:$0x1] }
 0x1e4   :  { %v2271_v40 = vpack.c.bf16 %v771_v39, %v768_v38 }
 0x1e5   :  { %v1932_v7 = vpop.f32.mrb[12].mxu0 }
 0x1e6   :  { %v2734_v8 = vadd.f32 %v1932_v7, %v386_v63  ;;  %v477_v9 = vpop.f32.mrb[13].mxu0 }
 0x1e7   :  { %v2736_v10 = vadd.f32 %v477_v9, %v381_v1 }
 0x1e8   :  { %v503_v17 = vmul.f32 %v2734_v8, %v2734_v8 }
 0x1e9   :  { %v1935_v11 = vpop.f32.mrb[14].mxu0  ;;  %1968 = vmatprep.mubr.f32.mxu1 %v2736_v10  ;;  %v502_v16 = vmul.f32 %v2736_v10, %v2736_v10 }
 0x1ea   :  { %v2739_v12 = vadd.f32 %v1935_v11, %v396_v4  ;;  %v487_v13 = vpop.f32.mrb[15].mxu0  ;;  %1969 = vmatmul.mubr.f32.vlgmr.msra.gmra.mrb[4].mxu1 %v2734_v8 }
 0x1eb   :  { %v2742_v15 = vadd.f32 %v487_v13, %v391_v6  ;;  %2262 = vmatpush3.bf16.msra.mxu1 %v2259_v31 }
 0x1ec   :  { %v505_v21 = vmul.f32 %v2739_v12, %v2739_v12  ;;  %2264 = vmatprep.subr.bf16.mxu1 %v2263_v34 }
 0x1ed   :  { %1971 = vmatprep.mubr.f32.mxu1 %v2742_v15  ;;  %v504_v19 = vmul.f32 %v2742_v15, %v2742_v15 }
 0x1ee   :  { %1972 = vmatmul.mubr.f32.gmra.mrb[6].mxu1 %v2739_v12 }
 0x1ef   :  { %1974 = vmatprep.mubr.f32.mxu1 %v502_v16  ;;  %2266 = vmatpush3.bf16.msra.mxu1 %v2263_v34 }
 0x1f0   :  { %2268 = vmatprep.subr.bf16.mxu1 %v2267_v37 }
 0x1f2   :  { %1975 = vmatmul.mubr.f32.gmra.mrb[8].mxu1 %v503_v17 }
 0x1f3   :  { %1977 = vmatprep.mubr.f32.mxu1 %v504_v19  ;;  %2270 = vmatpush3.bf16.msra.mxu1 %v2267_v37 }
 0x1f4   :  { %2272 = vmatprep.subr.bf16.mxu1 %v2271_v40 }
 0x1f6   :  { %1978 = vmatmul.mubr.f32.gmra.mrb[10].mxu1 %v505_v21 }
 0x1f7   :  { %2274 = vmatpush3.bf16.msra.mxu1 %v2271_v40 }
 0x1f8   :  { %2276 = vmatprep.subr.bf16.mxu1 %v2275_v43 }
 0x1fb   :  { %2278 = vmatpush3.bf16.msra.mxu1 %v2275_v43 }
 0x1fc   :  { %2280 = vmatprep.subr.bf16.mxu1 %v2279_v53 }
 0x1ff   :  { %2282 = vmatpush3.bf16.msra.mxu1 %v2279_v53  ;;  %v2815_v53 = vshrl.u32 %v648_v44, 7  ;;  %v781_v44 = vld [vmem:[%s3078_s2 + $0x108] sm:$0xff] }
 0x2bd   :  { %v1970_v54 = vpop.f32.mrb[4].mxu1 }
 0x2be   :  { %v613_v56 = vsel %vm611_vm2, %v1970_v54, 0.0  ;;  %v572_v57 = vpop.f32.mrb[5].mxu1 }
 0x2bf   :  { %v612_v59 = vsel %vm611_vm2, %v572_v57, 0.0  ;;  %v501_v57 = vld [vmem:[%s3080_s4] sm:$0x1] }
 0x2c0   :  { %v614_v60 = vadd.f32 %v613_v56, %v612_v59 }
 0x2c1   :  { %v1973_v62 = vpop.f32.mrb[6].mxu1 }
 0x2c2   :  { %v582_v63 = vpop.f32.mrb[7].mxu1  ;;  %v617_v2 = vsel %vm611_vm2, %v1973_v62, 0.0  ;;  %v748_v62 = vld [vmem:[%s3078_s2] sm:$0xff] }
 0x2c3   :  { %v615_v0 = vsel %vm611_vm2, %v582_v63, 0.0  ;;  %v751_v63 = vld [vmem:[%s3078_s2 + $0x18] sm:$0xff] }
 0x2c4   :  { %v616_v1 = vadd.f32 %v615_v0, %v614_v60  ;;  %v2821_v60 = vsub.s32 0, %v2815_v53 }
 0x2c5   :  { %v1976_v4 = vpop.f32.mrb[8].mxu1 }
 0x2c6   :  { %v618_v5 = vadd.f32 %v617_v2, %v616_v1  ;;  %v627_v6 = vsel %vm611_vm2, %v1976_v4, 0.0  ;;  %v592_v7 = vpop.f32.mrb[9].mxu1  ;;  %v755_v1 = vld [vmem:[%s3078_s2 + $0x38] sm:$0xff]  ;;  %v758_v2 = vld [vmem:[%s3078_s2 + $0x50] sm:$0xff] }
 0x2c7   :  { %v626_v9 = vsel %vm611_vm2, %v592_v7, 0.0  ;;  %v754_v7 = vld [vmem:[%s3078_s2 + $0x30] sm:$0xff] }
 0x2c8   :  { %v619_v11 = vrot.slane %v618_v5, 4  ;;  %v628_v13 = vadd.f32 %v627_v6, %v626_v9  ;;  %v2231_v6 = vpack.c.bf16 %v758_v2, %v755_v1  ;;  %v757_v9 = vld [vmem:[%s3078_s2 + $0x48] sm:$0xff] }
 0x2c9   :  { %v1979_v16 = vpop.f32.mrb[10].mxu1  ;;  %v789_v1 = vld [vmem:[%s3078_s2 + $0x148] sm:$0xff] }
 0x2ca   :  { %v620_v17 = vadd.f32 %v619_v11, %v618_v5  ;;  %v602_v19 = vpop.f32.mrb[11].mxu1  ;;  %v631_v27 = vsel %vm611_vm2, %v1979_v16, 0.0  ;;  %v2229_v5 = vpack.c.bf16 %v751_v63, %v748_v62  ;;  %v764_v16 = vld [vmem:[%s3078_s2 + $0x80] sm:$0xff]  ;;  %v787_v62 = vld [vmem:[%s3078_s2 + $0x138] sm:$0xff]  ;;  %v786_v63 = vld [vmem:[%s3078_s2 + $0x130] sm:$0xff] }
 0x2cb   :  { %v629_v21 = vsel %vm611_vm2, %v602_v19, 0.0  ;;  %v2283_v2 = vpack.c.bf16 %v789_v1, %v786_v63 }
 0x2cc   :  { %v621_v24 = vrot.slane %v620_v17, 2  ;;  %v630_v25 = vadd.f32 %v629_v21, %v628_v13  ;;  %v761_v13 = vld [vmem:[%s3078_s2 + $0x68] sm:$0xff]  ;;  %v760_v21 = vld [vmem:[%s3078_s2 + $0x60] sm:$0xff] }
 0x2cd   :  { %v2235_v19 = vpack.c.bf16 %v764_v16, %v761_v13  ;;  %2284 = vmatprep.subr.bf16.mxu1 %v2283_v2  ;;  %v795_v16 = vld [vmem:[%s3078_s2 + $0x178] sm:$0xff] }
 0x2ce   :  { %v622_v28 = vadd.f32 %v621_v24, %v620_v17  ;;  %v632_v30 = vadd.f32 %v631_v27, %v630_v25  ;;  %v2233_v17 = vpack.c.bf16 %v757_v9, %v754_v7  ;;  %v763_v24 = vld [vmem:[%s3078_s2 + $0x78] sm:$0xff]  ;;  %v770_v27 = vld [vmem:[%s3078_s2 + $0xb0] sm:$0xff]  ;;  %v793_v9 = vld [vmem:[%s3078_s2 + $0x168] sm:$0xff]  ;;  %2286 = vmatpush3.bf16.msra.mxu1 %v2283_v2 }
 0x2cf   :  { %v767_v25 = vld [vmem:[%s3078_s2 + $0x98] sm:$0xff]  ;;  %v790_v7 = vld [vmem:[%s3078_s2 + $0x150] sm:$0xff] }
 0x2d0   :  { %v623_v31 = vrot.slane %v622_v28, 1  ;;  %v633_v32 = vrot.slane %v632_v30, 4  ;;  %v2257_v13 = vpack.c.bf16 %v793_v9, %v790_v7 }
 0x2d2   :  { %v634_v33 = vadd.f32 %v633_v32, %v632_v30  ;;  %v624_v34 = vadd.f32 %v623_v31, %v622_v28  ;;  %v2237_v28 = vpack.c.bf16 %v763_v24, %v760_v21  ;;  %v2239_v30 = vpack.c.bf16 %v770_v27, %v767_v25  ;;  %v766_v31 = vld [vmem:[%s3078_s2 + $0x90] sm:$0xff]  ;;  %v769_v32 = vld [vmem:[%s3078_s2 + $0xa8] sm:$0xff] }
 0x2d4   :  { %v635_v35 = vrot.slane %v634_v33, 2  ;;  %v625_v37 = vmul.f32 0.001953125, %v624_v34  ;;  %v776_v34 = vld [vmem:[%s3078_s2 + $0xe0] sm:$0xff] }
 0x2d6   :  { %v636_v36 = vadd.f32 %v635_v35, %v634_v33  ;;  %v640_v40 = vmul.f32 %v625_v37, %v625_v37  ;;  %v773_v33 = vld [vmem:[%s3078_s2 + $0xc8] sm:$0xff]  ;;  %v2241_v35 = vpack.c.bf16 %v769_v32, %v766_v31 }
 0x2d8   :  { %v637_v38 = vrot.slane %v636_v36, 1 }
 0x2da   :  { %v638_v39 = vadd.f32 %v637_v38, %v636_v36  ;;  %v2243_v36 = vpack.c.bf16 %v776_v34, %v773_v33  ;;  %v775_v38 = vld [vmem:[%s3078_s2 + $0xd8] sm:$0xff] }
 0x2dc   :  { %v639_v41 = vmul.f32 0.001953125, %v638_v39  ;;  %v779_v39 = vld [vmem:[%s3078_s2 + $0xf8] sm:$0xff] }
 0x2de   :  { %v641_v42 = vsub.f32 %v639_v41, %v640_v40  ;;  %v782_v40 = vld [vmem:[%s3078_s2 + $0x110] sm:$0xff] }
 0x2e0   :  { %v642_v43 = vadd.f32 1e-05, %v641_v42  ;;  %v2247_v42 = vpack.c.bf16 %v782_v40, %v779_v39 }
 0x2e2   :  { %2342 = vrsqrt.f32 %v642_v43  ;;  %v778_v43 = vld [vmem:[%s3078_s2 + $0xf0] sm:$0xff] }
 0x2ec   :  { %v2343_v54 = vpop.eup %2342 }
 0x2ed   :  { %v644_v56 = vmul.f32 %v2343_v54, %v500_v45  ;;  %v2249_v45 = vpack.c.bf16 %v781_v44, %v778_v43  ;;  %v785_v54 = vld [vmem:[%s3078_s2 + $0x128] sm:$0xff] }
 0x2ef   :  { %v645_v59 = vmul.f32 %v644_v56, %v625_v37  ;;  %v772_v37 = vld [vmem:[%s3078_s2 + $0xc0] sm:$0xff] }
 0x2f0   :  { %v2245_v41 = vpack.c.bf16 %v775_v38, %v772_v37 }
 0x2f1   :  { %v646_v0 = vsub.f32 %v501_v57, %v645_v59  ;;  %v784_v59 = vld [vmem:[%s3078_s2 + $0x120] sm:$0xff] }
 0x2f3   :  { %v651_v4 = vrot.slane %v646_v0, %v2821_v60  ;;  %v2253_v0 = vpack.c.bf16 %v787_v62, %v784_v59 }
 0x2f5   :  { %v654_v11 = vsel %vm653_vm3, %v644_v56, %v651_v4  ;;  %v788_v56 = vld [vmem:[%s3078_s2 + $0x140] sm:$0xff]  ;;  %v791_v4 = vld [vmem:[%s3078_s2 + $0x158] sm:$0xff] }
 0x2f6   :  { %1983 = vmatmul.mubr.msk.f32.vlgmr.msra.gmra.mrb[16].mxu0 %vm611_vm2, %v654_v11  ;;  %v2251_v57 = vpack.c.bf16 %v788_v56, %v785_v54  ;;  %v792_v11 = vld [vmem:[%s3078_s2 + $0x160] sm:$0xff] }
 0x2f7   :  { %2230 = vmatpush1.bf16.msra.mxu0 %v2229_v5  ;;  %860 = vmatprep.mubr.f32.mxu0 %v2354_v3  ;;  %v794_v5 = vld [vmem:[%s3078_s2 + $0x170] sm:$0xff] }
 0x2f8   :  { %2232 = vmatprep.subr.bf16.mxu0 %v2231_v6  ;;  %v2255_v6 = vpack.c.bf16 %v794_v5, %v791_v4 }
 0x2fb   :  { %2234 = vmatpush1.bf16.msra.mxu0 %v2233_v17  ;;  %v2287_v17 = vpack.c.bf16 %v795_v16, %v792_v11 }
 0x2fc   :  { %2236 = vmatprep.subr.bf16.mxu0 %v2235_v19  ;;  %v738_v19 = vsub.s32 1, %v2815_v53 }
 0x2fd   :  { %2288 = vmatprep.subr.bf16.mxu1 %v2287_v17 }
 0x2fe   :  { %2290 = vmatpush3.bf16.msra.mxu1 %v2287_v17 }
 0x2ff   :  { %2238 = vmatpush1.bf16.msra.mxu0 %v2237_v28  ;;  %2308 = vmatprep.subr.bf16.mxu1 %v2613_v18 }
 0x300   :  { %2240 = vmatprep.subr.bf16.mxu0 %v2239_v30 }
 0x303   :  { %2242 = vmatpush1.bf16.msra.mxu0 %v2241_v35 }
 0x304   :  { %2244 = vmatprep.subr.bf16.mxu0 %v2243_v36 }
 0x307   :  { %2246 = vmatpush1.bf16.msra.mxu0 %v2245_v41 }
 0x308   :  { %2248 = vmatprep.subr.bf16.mxu0 %v2247_v42 }
 0x30b   :  { %2250 = vmatpush1.bf16.msra.mxu0 %v2249_v45 }
 0x30c   :  { %2252 = vmatprep.subr.bf16.mxu0 %v2251_v57 }
 0x30f   :  { %2254 = vmatpush1.bf16.msra.mxu0 %v2253_v0 }
 0x310   :  { %2256 = vmatprep.subr.bf16.mxu0 %v2255_v6 }
 0x313   :  { %2258 = vmatpush1.bf16.msra.mxu0 %v2257_v13 }
 0x3c9   :  { %v724_v21 = vpop.f32.mrb[16].mxu0 }
 0x3ca   :  { %v731_v24 = vrot.slane %v724_v21, %v2821_v60  ;;  %v1984_v25 = vpop.f32.mrb[17].mxu0  ;;  %v739_v30 = vrot.slane %v724_v21, %v738_v19 }
 0x3cc   :  { %v732_v27 = vmul.f32 %v731_v24, %v2736_v10  ;;  %v733_v28 = vmul.f32 %v731_v24, %v2734_v8  ;;  %v734_v31 = vmul.f32 %v731_v24, %v2742_v15  ;;  %v735_v32 = vmul.f32 %v731_v24, %v2739_v12 }
 0x3ce   :  { %v741_v33 = vadd.f32 %v739_v30, %v733_v28  ;;  %v740_v34 = vadd.f32 %v739_v30, %v732_v27  ;;  %v742_v35 = vadd.f32 %v739_v30, %v734_v31  ;;  %v743_v38 = vadd.f32 %v739_v30, %v735_v32 }
 0x3d0   :  { %v745_v36 = vmax.f32 %v741_v33, 0.0  ;;  %v744_v37 = vmax.f32 %v740_v34, 0.0  ;;  %v746_v39 = vmax.f32 %v742_v35, 0.0  ;;  %v747_v8 = vmax.f32 %v743_v38, 0.0 }
 0x3d2   :  { %861 = vmatmul.mubr.f32.vlgmr.msra.gmra.mrb[18].mxu0 %v744_v37  ;;  %2017 = vmatprep.mubr.f32.mxu1 %v744_v37 }
 0x3d3   :  { %2018 = vmatmul.mubr.f32.vlgmr.msra.gmra.mrb[12].mxu1 %v745_v36  ;;  %866 = vmatprep.mubr.f32.mxu0 %v2354_v3 }
 0x3d4   :  { %2020 = vmatprep.mubr.f32.mxu1 %v746_v39  ;;  %2310 = vmatpush3.bf16.msra.mxu1 %v2613_v18 }
 0x3d5   :  { %2312 = vmatprep.subr.bf16.mxu1 %v2618_v20 }
 0x3d6   :  { %867 = vmatmul.mubr.f32.gmra.mrb[20].mxu0 %v745_v36 }
 0x3d7   :  { %2021 = vmatmul.mubr.f32.gmra.mrb[14].mxu1 %v747_v8  ;;  %872 = vmatprep.mubr.f32.mxu0 %v2354_v3 }
 0x3d8   :  { %2314 = vmatpush3.bf16.msra.mxu1 %v2618_v20 }
 0x3d9   :  { %2316 = vmatprep.subr.bf16.mxu1 %v2629_v23 }
 0x3da   :  { %873 = vmatmul.mubr.f32.gmra.mrb[22].mxu0 %v746_v39 }
 0x3db   :  { %878 = vmatprep.mubr.f32.mxu0 %v2354_v3 }
 0x3dc   :  { %2318 = vmatpush3.bf16.msra.mxu1 %v2629_v23 }
 0x3dd   :  { %2320 = vmatprep.subr.bf16.mxu1 %v2639_v26 }
 0x3de   :  { %879 = vmatmul.mubr.f32.gmra.mrb[24].mxu0 %v747_v8 }
 0x3df   :  { %2031 = vmatprep.mubr.msk.f32.mxu0 %vm301_vm0, %v2600_v14 }
 0x3e0   :  { %2322 = vmatpush3.bf16.msra.mxu1 %v2639_v26 }
 0x3e1   :  { %2324 = vmatprep.subr.bf16.mxu1 %v2649_v29 }
 0x3e4   :  { %2326 = vmatpush3.bf16.msra.mxu1 %v2649_v29 }
 0x3e5   :  { %2328 = vmatprep.subr.bf16.mxu1 %v2710_v55 }
 0x3e8   :  { %2330 = vmatpush3.bf16.msra.mxu1 %v2710_v55 }
 0x3e9   :  { %2332 = vmatprep.subr.bf16.mxu1 %v2720_v58 }
 0x3ec   :  { %2334 = vmatpush3.bf16.msra.mxu1 %v2720_v58 }
 0x3ed   :  { %2336 = vmatprep.subr.bf16.mxu1 %v2730_v61 }
 0x3f0   :  { %2338 = vmatpush3.bf16.msra.mxu1 %v2730_v61 }
 0x4a5   :  { %v862_v18 = vpop.f32.mrb[18].mxu0 }
 0x4a6   :  { %v864_v14 = vpop.f32.mrb[19].mxu0  ;;  %v2019_v20 = vpop.f32.mrb[12].mxu1 }
 0x4a7   :  { %v951_v23 = vpop.f32.mrb[13].mxu1 }
 0x4a8   :  { %v2299_v26 = vpack.c.bf16 %v2019_v20, %v951_v23 }
 0x4a9   :  { %v868_v10 = vpop.f32.mrb[20].mxu0 }
 0x4aa   :  { %v2291_v12 = vpack.c.bf16 %v868_v10, %v862_v18  ;;  %v870_v29 = vpop.f32.mrb[21].mxu0  ;;  %v2022_v15 = vpop.f32.mrb[14].mxu1 }
 0x4ab   :  { %v961_v40 = vpop.f32.mrb[15].mxu1 }
 0x4ac   :  { %v2303_v41 = vpack.c.bf16 %v2022_v15, %v961_v40  ;;  %2292 = vmatprep.subr.bf16.mxu0 %v2291_v12 }
 0x4ad   :  { %v874_v55 = vpop.f32.mrb[22].mxu0  ;;  %2294 = vmatpush3.bf16.msra.mxu0 %v2291_v12 }
 0x4ae   :  { %v876_v42 = vpop.f32.mrb[23].mxu0 }
 0x4b1   :  { %v880_v58 = vpop.f32.mrb[24].mxu0 }
 0x4b2   :  { %v2295_v43 = vpack.c.bf16 %v880_v58, %v874_v55  ;;  %v882_v44 = vpop.f32.mrb[25].mxu0 }
 0x4b4   :  { %2296 = vmatprep.subr.bf16.mxu0 %v2295_v43 }
 0x4b5   :  { %2298 = vmatpush3.bf16.msra.mxu0 %v2295_v43 }
 0x4b6   :  { %2300 = vmatprep.subr.bf16.mxu0 %v2299_v26 }
 0x4b8   :  { %2032 = vmatmul.mubr.msk.f32.vlgmr.msra.gmra.mrb[26].mxu0 %vm301_vm0, %v2657_v46 }
 0x4b9   :  { %2302 = vmatpush3.bf16.msra.mxu0 %v2299_v26  ;;  %2034 = vmatprep.mubr.msk.f32.mxu0 %vm301_vm0, %v2662_v47 }
 0x4ba   :  { %2304 = vmatprep.subr.bf16.mxu0 %v2303_v41 }
 0x4bc   :  { %2035 = vmatmul.mubr.msk.f32.gmra.mrb[28].mxu0 %vm301_vm0, %v2671_v48 }
 0x4bd   :  { %2306 = vmatpush3.bf16.msra.mxu0 %v2303_v41  ;;  %2045 = vmatprep.mubr.msk.f32.mxu0 %vm301_vm0, %v2676_v49 }
 0x4be   :  { %2095 = vmatprep.subr.mxu0 %v2354_v3 }
 0x4c0   :  { %2046 = vmatmul.mubr.msk.f32.vlgmr.msra.gmra.mrb[30].mxu0 %vm301_vm0, %v2685_v50 }
 0x4c1   :  { %2048 = vmatprep.mubr.msk.f32.mxu0 %vm301_vm0, %v2690_v51  ;;  %2096 = vmatpush3.msra.mxu0 %v2757_v22 }
 0x4c2   :  { %2100 = vmatprep.subr.mxu0 %v2354_v3 }
 0x4c4   :  { %2049 = vmatmul.mubr.msk.f32.gmra.mrb[32].mxu0 %vm301_vm0, %v2700_v52 }
 0x4c5   :  { %2097 = vmatprep.mubr.msk.f32.mxu0 %vm2355_vm1, %v2354_v3 }
 0x58b   :  { %v2033_v46 = vpop.f32.mrb[26].mxu0 }
 0x58c   :  { %v1042_v47 = vadd.f32 %v2033_v46, %v870_v29  ;;  %v1036_v48 = vpop.f32.mrb[27].mxu0 }
 0x58d   :  { %v1037_v49 = vadd.f32 %v1036_v48, %v864_v14 }
 0x58f   :  { %v2036_v61 = vpop.f32.mrb[28].mxu0 }
 0x590   :  { %v1052_v45 = vadd.f32 %v2036_v61, %v882_v44  ;;  %v1046_v50 = vpop.f32.mrb[29].mxu0 }
 0x591   :  { %v1047_v54 = vadd.f32 %v1046_v50, %v876_v42 }
 0x593   :  { %v2047_v56 = vpop.f32.mrb[30].mxu0 }
 0x594   :  { %v2977_v51 = vadd.f32 %v2047_v56, %v1042_v47  ;;  %v1121_v57 = vpop.f32.mrb[31].mxu0 }
 0x595   :  { %v2979_v59 = vadd.f32 %v1121_v57, %v1037_v49 }
 0x596   :  { %v1147_v2 = vmul.f32 %v2977_v51, %v2977_v51 }
 0x597   :  { %v2050_v62 = vpop.f32.mrb[32].mxu0  ;;  %2083 = vmatprep.mubr.f32.mxu1 %v2979_v59  ;;  %v1146_v1 = vmul.f32 %v2979_v59, %v2979_v59 }
 0x598   :  { %v2982_v52 = vadd.f32 %v2050_v62, %v1052_v45  ;;  %v1131_v63 = vpop.f32.mrb[33].mxu0  ;;  %2084 = vmatmul.mubr.f32.vlgmr.msra.gmra.mrb[16].mxu1 %v2977_v51 }
 0x599   :  { %v2985_v0 = vadd.f32 %v1131_v63, %v1047_v54  ;;  %v1144_v63 = vld [vmem:[%s3081_s5] sm:$0x1] }
 0x59a   :  { %v1149_v5 = vmul.f32 %v2982_v52, %v2982_v52 }
 0x59b   :  { %2086 = vmatprep.mubr.f32.mxu1 %v2985_v0  ;;  %v1148_v4 = vmul.f32 %v2985_v0, %v2985_v0 }
 0x59c   :  { %2087 = vmatmul.mubr.f32.gmra.mrb[18].mxu1 %v2982_v52 }
 0x59d   :  { %2089 = vmatprep.mubr.f32.mxu1 %v1146_v1 }
 0x5a0   :  { %2090 = vmatmul.mubr.f32.gmra.mrb[20].mxu1 %v1147_v2 }
 0x5a1   :  { %2092 = vmatprep.mubr.f32.mxu1 %v1148_v4 }
 0x5a4   :  { %2093 = vmatmul.mubr.f32.gmra.mrb[22].mxu1 %v1149_v5 }
 0x66b   :  { %v2085_v6 = vpop.f32.mrb[16].mxu1 }
 0x66c   :  { %v1256_v7 = vsel %vm611_vm2, %v2085_v6, 0.0  ;;  %v1216_v9 = vpop.f32.mrb[17].mxu1  ;;  %v1145_v6 = vld [vmem:[%s3082_s6] sm:$0x1] }
 0x66d   :  { %v1255_v11 = vsel %vm611_vm2, %v1216_v9, 0.0 }
 0x66e   :  { %v1257_v13 = vadd.f32 %v1256_v7, %v1255_v11 }
 0x66f   :  { %v2088_v16 = vpop.f32.mrb[18].mxu1 }
 0x670   :  { %v1260_v17 = vsel %vm611_vm2, %v2088_v16, 0.0  ;;  %v1226_v21 = vpop.f32.mrb[19].mxu1  ;;  %v1386_v41 = vrot.slane %v1257_v13, 4 }
 0x671   :  { %v1258_v24 = vsel %vm611_vm2, %v1226_v21, 0.0 }
 0x672   :  { %v1259_v25 = vadd.f32 %v1258_v24, %v1257_v13  ;;  %v1392_v27 = vadd.f32 %v1260_v17, %v1258_v24  ;;  %v1387_v44 = vadd.f32 %v1386_v41, %v1257_v13 }
 0x673   :  { %v2091_v28 = vpop.f32.mrb[20].mxu1 }
 0x674   :  { %v1261_v30 = vadd.f32 %v1260_v17, %v1259_v25  ;;  %v1270_v31 = vsel %vm611_vm2, %v2091_v28, 0.0  ;;  %v1236_v32 = vpop.f32.mrb[21].mxu1  ;;  %v1393_v55 = vrot.slane %v1392_v27, 4  ;;  %v1388_v61 = vrot.slane %v1387_v44, 2  ;;  %v1411_v25 = vld [vmem:[%s3083_s7] sm:$0xff] }
 0x675   :  { %v1269_v33 = vsel %vm611_vm2, %v1236_v32, 0.0 }
 0x676   :  { %v1262_v34 = vrot.slane %v1261_v30, 4  ;;  %v1271_v35 = vadd.f32 %v1270_v31, %v1269_v33  ;;  %v1394_v46 = vadd.f32 %v1393_v55, %v1392_v27  ;;  %v1389_v54 = vadd.f32 %v1388_v61, %v1387_v44  ;;  %v1497_v33 = vld [vmem:[%s3084_s9] sm:$0xf] }
 0x677   :  { %v2094_v36 = vpop.f32.mrb[22].mxu1 }
 0x678   :  { %v1263_v37 = vadd.f32 %v1262_v34, %v1261_v30  ;;  %v1246_v38 = vpop.f32.mrb[23].mxu1  ;;  %v1274_v14 = vsel %vm611_vm2, %v2094_v36, 0.0  ;;  %v1395_v45 = vrot.slane %v1394_v46, 2  ;;  %v1390_v57 = vrot.slane %v1389_v54, 1  ;;  %v1733_v36 = vld [vmem:[%s3085_s8] ss:$0 sm:$0xff] }
 0x679   :  { %v1272_v39 = vsel %vm611_vm2, %v1246_v38, 0.0 }
 0x67a   :  { %v1264_v8 = vrot.slane %v1263_v37, 2  ;;  %v1273_v18 = vadd.f32 %v1272_v39, %v1271_v35  ;;  %v1396_v56 = vadd.f32 %v1395_v45, %v1394_v46  ;;  %v1391_v1 = vadd.f32 %v1390_v57, %v1389_v54 }
 0x67c   :  { %v1265_v20 = vadd.f32 %v1264_v8, %v1263_v37  ;;  %v1275_v23 = vadd.f32 %v1274_v14, %v1273_v18  ;;  %v1397_v62 = vrot.slane %v1396_v56, 1  ;;  %v1399_v7 = vmul.f32 0.00390625, %v1391_v1  ;;  %v1735_v18 = vld [vmem:[%s3086_s10] ss:$0 sm:$0xff] }
 0x67e   :  { %v1266_v26 = vrot.slane %v1265_v20, 1  ;;  %v1276_v10 = vrot.slane %v1275_v23, 4  ;;  %v1398_v2 = vadd.f32 %v1397_v62, %v1396_v56 }
 0x680   :  { %v1277_v12 = vadd.f32 %v1276_v10, %v1275_v23  ;;  %v1267_v29 = vadd.f32 %v1266_v26, %v1265_v20  ;;  %v1400_v9 = vmul.f32 0.00390625, %v1398_v2 }
 0x682   :  { %v1278_v15 = vrot.slane %v1277_v12, 2  ;;  %v1268_v42 = vmul.f32 0.001953125, %v1267_v29 }
 0x684   :  { %v1279_v40 = vadd.f32 %v1278_v15, %v1277_v12  ;;  %v1283_v47 = vmul.f32 %v1268_v42, %v1268_v42  ;;  %v2356_v15 = vmov 1966171168  }
 0x686   :  { %v1280_v58 = vrot.slane %v1279_v40, 1 }
 0x688   :  { %v1281_v43 = vadd.f32 %v1280_v58, %v1279_v40 }
 0x68a   :  { %v1282_v48 = vmul.f32 0.001953125, %v1281_v43 }
 0x68c   :  { %v1284_v49 = vsub.f32 %v1282_v48, %v1283_v47 }
 0x68e   :  { %v1285_v50 = vadd.f32 1e-05, %v1284_v49 }
 0x690   :  { %2344 = vrsqrt.f32 %v1285_v50 }
 0x69a   :  { %v2345_v4 = vpop.eup %2344 }
 0x69b   :  { %v1287_v5 = vmul.f32 %v2345_v4, %v1144_v63  ;;  %v2352_v4 = vld [vmem:[%s3073_s0 + $0x10] sm:$0xff] }
 0x69d   :  { %v1288_v11 = vmul.f32 %v1287_v5, %v1268_v42  ;;  %v1405_v13 = vrot.slane %v1287_v5, %v2821_v60 }
 0x69f   :  { %v1289_v16 = vsub.f32 %v1145_v6, %v1288_v11  ;;  %v1407_v17 = vmul.f32 %v1405_v13, %v1399_v7  ;;  %v1408_v21 = vmul.f32 %v1405_v13, %v1400_v9 }
 0x6a1   :  { %v1294_v24 = vrot.slane %v1289_v16, %v2821_v60 }
 0x6a3   :  { %v1296_v27 = vsel %vm653_vm3, %v1287_v5, %v1294_v24  ;;  %v1409_v28 = vadd.f32 %v1407_v17, %v1294_v24  ;;  %v1410_v30 = vadd.f32 %v1408_v21, %v1294_v24 }
 0x6a4   :  { %2098 = vmatmul.mubr.msk.f32.vlgmr.msra.gmra.mrb[34].mxu0 %vm611_vm2, %v1296_v27 }
 0x6a5   :  { %2101 = vmatpush3.msra.mxu0 %v1411_v25  ;;  %2102 = vmatprep.mubr.msk.f32.mxu0 %vm2355_vm1, %v2354_v3  ;;  %v1421_v31 = vrot.slane %v1410_v30, 7 }
 0x6a6   :  { %2105 = vmatprep.subr.mxu0 %v2354_v3 }
 0x6a7   :  { %v1423_v32 = vsel %vm1422_vm4, %v1421_v31, %v1409_v28 }
 0x6a8   :  { %2103 = vmatmul.mubr.msk.f32.vlgmr.msra.gmra.mrb[36].mxu0 %vm611_vm2, %v1423_v32 }
 0x6a9   :  { %2107 = vmatprep.mubr.msk.f32.mxu0 %vm2355_vm1, %v2354_v3  ;;  %2106 = vmatpush3.msk.msra.mxu0 %vm1509_vm5, %v1497_v33 }
 0x6aa   :  { %2110 = vmatprep.subr.mxu0 %v2354_v3 }
 0x777   :  { %v1366_v34 = vpop.f32.mrb[34].mxu0 }
 0x778   :  { %v2099_v35 = vpop.f32.mrb[35].mxu0  ;;  %v1381_v48 = vrot.slane %v1366_v34, %v738_v19 }
 0x77b   :  { %v1492_v37 = vpop.f32.mrb[36].mxu0 }
 0x77c   :  { %v1493_v38 = vadd.f32 %v1733_v36, %v1492_v37  ;;  %v2104_v39 = vpop.f32.mrb[37].mxu0 }
 0x77e   :  { %v1496_v8 = vmax.f32 %v1493_v38, 0.0 }
 0x780   :  { %2108 = vmatmul.mubr.msk.f32.vlgmr.msra.gmra.mrb[38].mxu0 %vm1505_vm6, %v1496_v8 }
 0x781   :  { %2111 = vmatpush3.msra.mxu0 %v2757_v22  ;;  %2112 = vmatprep.mubr.msk.f32.mxu0 %vm2355_vm1, %v2354_v3  ;;  %v1664_v22 = vunpack.c.l.s4 %v2356_v15  ;;  %v1373_v3 = vrot.slane %v1366_v34, %v2821_v60 }
 0x783   :  { %v1665_v40 = vunpack.c.0.s8 %v1664_v22  ;;  %v1374_v42 = vmul.f32 %v1373_v3, %v2979_v59  ;;  %v1375_v58 = vmul.f32 %v1373_v3, %v2977_v51  ;;  %v1376_v46 = vmul.f32 %v1373_v3, %v2985_v0 }
 0x784   :  { %v1377_v47 = vmul.f32 %v1373_v3, %v2982_v52  ;;  %v2351_v52 = vld [vmem:[%s3073_s0 + $0x8] sm:$0xff] }
 0x785   :  { %v1668_v41 = vsub.s32 %v1665_v40, %v2815_v53  ;;  %v1382_v45 = vadd.f32 %v1381_v48, %v1374_v42  ;;  %v1383_v50 = vadd.f32 %v1381_v48, %v1375_v58  ;;  %v1384_v57 = vadd.f32 %v1381_v48, %v1376_v46  ;;  %v2350_v53 = vld [vmem:[%s3073_s0] sm:$0xff] }
 0x786   :  { %v1385_v59 = vadd.f32 %v1381_v48, %v1377_v47 }
 0x853   :  { %v1579_v14 = vpop.f32.mrb[38].mxu0 }
 0x854   :  { %v1580_v20 = vadd.f32 %v1735_v18, %v1579_v14  ;;  %v2109_v23 = vpop.f32.mrb[39].mxu0 }
 0x856   :  { %v1738_v26 = vmul.f32 -1.442695, %v1580_v20 }
 0x858   :  { %2346 = vpow2.f32 %v1738_v26 }
 0x862   :  { %v2347_v10 = vpop.eup %2346 }
 0x863   :  { %v1586_v12 = vadd.f32 1.0, %v2347_v10 }
 0x865   :  { %2348 = vrcp.f32 %v1586_v12 }
 0x86f   :  { %v2349_v29 = vpop.eup %2348 }
 0x870   :  { %2113 = vmatmul.mubr.msk.f32.vlgmr.msra.gmra.mrb[40].mxu0 %vm611_vm2, %v2349_v29 }
 0x943   :  { %v1658_v55 = vpop.f32.mrb[40].mxu0 }
 0x944   :  { %v1669_v43 = vrot.slane %v1658_v55, %v1668_v41  ;;  %v2114_v44 = vpop.f32.mrb[41].mxu0 }
 0x946   :  { %v1670_v49 = vcombine.high %v1669_v43, %v1669_v43  ;;  %v1677_v61 = vrot.slane %v1669_v43, %v1668_v41 }
 0x948   :  { %v1684_v54 = vrot.slane %v1670_v49, %v1668_v41  ;;  %v1688_v56 = vrot.slane %v1677_v61, %v2821_v60 }
 0x94a   :  { %v1692_v51 = vrot.slane %v1684_v54, %v2821_v60  ;;  %v1695_v62 = vmul.f32 %v1688_v56, %v1382_v45  ;;  %v1696_v63 = vmul.f32 %v1688_v56, %v1383_v50  ;;  %v2353_v60 = vld [vmem:[%s3073_s0 + $0x18] sm:$0xff] }
 0x94c   :  { %v1697_v1 = vmul.f32 %v1692_v51, %v1384_v57  ;;  %v1698_v0 = vmul.f32 %v1692_v51, %v1385_v59  ;;  %v1699_v19 = vadd.f32 %v2350_v53, %v1695_v62  ;;  %v1700_v2 = vadd.f32 %v2351_v52, %v1696_v63 }
 0x94e   :  { %v1701_v5 = vadd.f32 %v2352_v4, %v1697_v1  ;;  %v1702_v6 = vadd.f32 %v2353_v60, %v1698_v0  ;;  %v1703_v7 = vmax.f32 %v1699_v19, 0.0  ;;  %v1704_v9 = vmax.f32 %v1700_v2, 0.0 }
 0x950   :  { %v1705_v11 = vmax.f32 %v1701_v5, 0.0  ;;  %v1706_v13 = vmax.f32 %v1702_v6, 0.0  ;;  %1707 = vst [vmem:[%s3087_s15] sm:$0xff] %v1703_v7  ;;  %1708 = vst [vmem:[%s3087_s15 + $0x8] sm:$0xff] %v1704_v9 }
 0x952   :  { %1709 = vst [vmem:[%s3087_s15 + $0x10] sm:$0xff] %v1705_v11  ;;  %1710 = vst [vmem:[%s3087_s15 + $0x18] sm:$0xff] %v1706_v13 }

</bundles_post_ra>
